<compile_context>
chip_gen: v7x
topology: tpu7x:2x2x1
jax: 0.10.0
libtpu: 0.0.40
codegen_flags: <defaults>
</compile_context>

<pallas_src>
import functools

import jax
import jax.numpy as jnp
from jax import lax
from jax.experimental import pallas as pl
from jax.experimental.pallas import tpu as pltpu

# WeightedDiceBCE always constructs its sub-losses with these fixed weights.
_DICE_W = (0.5, 0.5)
_BCE_W = (0.5, 0.5)
_SMOOTH = 1e-5
_EPS = 1e-12
_LANES = 128


def _round_up(a, m):
    return (a + m - 1) // m * m


def _tc_topology():
    """Best-effort (num TensorCores per device, is_v7x) from the device kind."""
    try:
        kind = jax.devices()[0].device_kind.lower()
    except Exception:
        return 1, False
    is_v7 = "v7" in kind
    multi_tc = is_v7 or ("v4" in kind) or ("v5p" in kind)   # megacore chips
    return (2 if multi_tc else 1), is_v7


def _partials_kernel(x_ref, t_ref, dice_o_ref, bce_o_ref, dice_acc, bce_acc,
                     *, binary_targets):
    """Accumulate raw dice/BCE partial sums for one feature shard (grid axis 0).

    Blocks are (B, t_blk, SUBL, 128).  An inner fori_loop walks the t_blk axis
    one (B, SUBL, 128) tile at a time so each vreg is live exactly once.
    """
    j = pl.program_id(1)

    @pl.when(j == 0)
    def _():
        dice_acc[...] = jnp.zeros_like(dice_acc)
        bce_acc[...] = jnp.zeros_like(bce_acc)

    t_blk = x_ref.shape[1]           # static (block shape)
    dshape = dice_acc.shape[1:]      # (B, SUBL, 128)
    sshape = bce_acc.shape[1:]       # (SUBL, 128)

    def load_tile(ref, i):
        # Dynamic slice on a non-minor dim; squeeze is a free reshape.
        blk = ref[:, pl.ds(i, 1)]            # (B, 1, SUBL, 128), native dtype
        return blk[:, 0].astype(jnp.float32)  # widen on-chip, one tile at a time

    # TODO(synk): for very large B (> ~8) move the per-sample dice partials from
    # loop carries into the VMEM scratch inside the loop to bound vreg pressure.
    if binary_targets:
        # Binary-mask fast path: t in {0, 1}.  pos == t, t*t == t, and BCE needs
        # a single log via operand select.  neg terms are derived in the wrapper.
        def body(i, carry):
            xt_a, xx_a, t_a, ll_a, pll_a = carry
            x = load_tile(x_ref, i)
            t = load_tile(t_ref, i)
            xt_a = xt_a + x * t
            xx_a = xx_a + x * x
            t_a = t_a + t                               # == sum(t*t) for masks
            v = jnp.where(t > 0.5, x, 1.0 - x)          # single-log select
            l = jnp.maximum(jnp.log(v), -100.0)         # torch BCE clamp
            ll_a = ll_a + jnp.sum(l, axis=0)            # total (negated in wrapper)
            pll_a = pll_a + jnp.sum(t * l, axis=0)      # positive part
            return xt_a, xx_a, t_a, ll_a, pll_a

        init = (jnp.zeros(dshape, jnp.float32),) * 3 \
             + (jnp.zeros(sshape, jnp.float32),) * 2
        xt_a, xx_a, t_a, ll_a, pll_a = lax.fori_loop(
            0, t_blk, body, init, unroll=(2 if t_blk >= 2 else 1))
        dice_acc[0] += xt_a
        dice_acc[1] += xx_a
        dice_acc[2] += t_a
        bce_acc[0] += ll_a
        bce_acc[1] += pll_a
    else:
        # Exact torch formulation (soft targets, t == 0.5 excluded from pos & neg).
        def body(i, carry):
            xt_a, xx_a, tt_a, pll_a, nll_a, pc_a, nc_a = carry
            x = load_tile(x_ref, i)
            t = load_tile(t_ref, i)
            xt_a = xt_a + x * t
            xx_a = xx_a + x * x
            tt_a = tt_a + t * t
            log_x = jnp.maximum(jnp.log(x), -100.0)
            log_1mx = jnp.maximum(jnp.log(1.0 - x), -100.0)
            ll = t * log_x + (1.0 - t) * log_1mx        # == -bce element
            pos = (t > 0.5).astype(jnp.float32)
            neg = (t < 0.5).astype(jnp.float32)
            pll_a = pll_a + jnp.sum(pos * ll, axis=0)
            nll_a = nll_a + jnp.sum(neg * ll, axis=0)
            pc_a = pc_a + jnp.sum(pos, axis=0)
            nc_a = nc_a + jnp.sum(neg, axis=0)
            return xt_a, xx_a, tt_a, pll_a, nll_a, pc_a, nc_a

        init = (jnp.zeros(dshape, jnp.float32),) * 3 \
             + (jnp.zeros(sshape, jnp.float32),) * 4
        xt_a, xx_a, tt_a, pll_a, nll_a, pc_a, nc_a = lax.fori_loop(
            0, t_blk, body, init, unroll=(2 if t_blk >= 2 else 1))
        dice_acc[0] += xt_a
        dice_acc[1] += xx_a
        dice_acc[2] += tt_a
        bce_acc[0] += pll_a
        bce_acc[1] += nll_a
        bce_acc[2] += pc_a
        bce_acc[3] += nc_a

    @pl.when(j == pl.num_programs(1) - 1)
    def _():
        dice_o_ref[0] = dice_acc[...]
        bce_o_ref[0] = bce_acc[...]


def weighted_dice_bce(inputs, targets, dice_weight=1.0, bce_weight=1.0,
                      binary_targets=True):
    """Forward of WeightedDiceBCE(dice_weight, BCE_weight) -> scalar f32.

    binary_targets=True enables the fast path (exact for targets in {0, 1});
    set False for soft / non-binary targets (exact torch semantics).
    """
    b = inputs.shape[0]
    # Keep the native dtype in HBM (bf16 halves traffic); widening is in-kernel.
    # Note: bf16 inputs lose a little precision in (1 - x) near x ~= 1 before the
    # in-kernel f32 cast -- inherent to keeping HBM traffic in bf16.
    x = inputs.reshape(b, -1)
    t = targets.reshape(b, -1)
    d = x.shape[1]

    # --- dtype-aware tiling: whole native (SUBL, 128) tiles ------------------
    min_item = max(1, min(x.dtype.itemsize, t.dtype.itemsize))
    max_item = max(x.dtype.itemsize, t.dtype.itemsize)
    subl = max(8, 32 // min_item)            # f32: 8, bf16: 16, int8: 32
    tile_elems = subl * _LANES

    tiles = -(-d // tile_elems)
    # ~4 MiB per input block (largest dtype): 2 inputs x 2 buffers = 16 MiB VMEM.
    t_blk = max(1, (4 << 20) // (b * tile_elems * max_item))
    t_blk = min(t_blk, tiles)
    n_blocks = -(-tiles // t_blk)

    n_cores, is_v7 = _tc_topology()
    nsplit = 2 if (n_cores >= 2 and n_blocks >= 2) else 1
    n_blocks = _round_up(n_blocks, nsplit)
    steps = n_blocks // nsplit
    tiles_pad = n_blocks * t_blk
    pad = tiles_pad * tile_elems - d

    if pad:
        # Zero padding (x=0, t=0) contributes nothing to the dice sums or either
        # BCE numerator; it only inflates the negative count, corrected below.
        x = jnp.pad(x, ((0, 0), (0, pad)))
        t = jnp.pad(t, ((0, 0), (0, pad)))
    x = x.reshape(b, tiles_pad, subl, _LANES)
    t = t.reshape(b, tiles_pad, subl, _LANES)

    n_bce = 2 if binary_targets else 4
    if nsplit > 1 and is_v7:
        dim_sem = (pltpu.CORE_PARALLEL, pltpu.ARBITRARY)   # real cross-TC shard
    else:
        dim_sem = ("parallel", "arbitrary")

    kernel = functools.partial(_partials_kernel, binary_targets=binary_targets)

    dice_raw, bce_raw = pl.pallas_call(
        kernel,
        out_shape=(
            jax.ShapeDtypeStruct((nsplit, 3, b, subl, _LANES), jnp.float32),
            jax.ShapeDtypeStruct((nsplit, n_bce, subl, _LANES), jnp.float32),
        ),
        grid_spec=pltpu.PrefetchScalarGridSpec(
            num_scalar_prefetch=0,
            grid=(nsplit, steps),
            in_specs=[
                pl.BlockSpec((b, t_blk, subl, _LANES),
                             lambda c, j: (0, c * steps + j, 0, 0)),
                pl.BlockSpec((b, t_blk, subl, _LANES),
                             lambda c, j: (0, c * steps + j, 0, 0)),
            ],
            out_specs=[
                pl.BlockSpec((1, 3, b, subl, _LANES),
                             lambda c, j: (c, 0, 0, 0, 0)),
                pl.BlockSpec((1, n_bce, subl, _LANES),
                             lambda c, j: (c, 0, 0, 0)),
            ],
            scratch_shapes=[
                pltpu.VMEM((3, b, subl, _LANES), jnp.float32),
                pltpu.VMEM((n_bce, subl, _LANES), jnp.float32),
            ]),
        compiler_params=pltpu.CompilerParams(
            dimension_semantics=dim_sem,
            vmem_limit_bytes=32 * 1024 * 1024),
    )(x, t)

    # --- tiny final combine (a few dozen scalar ops) in plain JAX -------------
    s = jnp.sum(dice_raw, axis=(0, 3, 4))        # (3, B): sum(xt), sum(xx), sum(tt)
    inter = 0.25 * s[0]                          # pixel weight w == 0.5 folded
    union = 0.25 * (s[1] + s[2])
    dice = jnp.mean(1.0 - (2.0 * inter + _SMOOTH) / (union + _SMOOTH))

    p = jnp.sum(bce_raw, axis=(0, 2, 3))
    if binary_targets:
        tot_loss = -p[0]
        pos_loss = -p[1]
        neg_loss = tot_loss - pos_loss
        pos_cnt = jnp.sum(s[2])                  # sum(t) over batch == pos count
        neg_cnt = float(b * d) - pos_cnt         # padding never counted
    else:
        pos_loss = -p[0]
        neg_loss = -p[1]
        pos_cnt = p[2]
        neg_cnt = p[3] - float(b * pad)          # remove padded elements
    bce = (_BCE_W[0] * pos_loss / (pos_cnt + _EPS)
           + _BCE_W[1] * neg_loss / (neg_cnt + _EPS))

    return dice_weight * dice + bce_weight * bce


def _reference(inputs, targets, dice_weight=1.0, bce_weight=1.0):
    """Pure-JAX reference mirroring the PyTorch module semantics."""
    b = inputs.shape[0]
    x = inputs.reshape(b, -1).astype(jnp.float32)
    t = targets.reshape(b, -1).astype(jnp.float32)
    # WeightedDiceLoss([0.5, 0.5])
    w = t * (_DICE_W[1] - _DICE_W[0]) + _DICE_W[0]
    p = w * x
    tw = w * t
    inter = jnp.sum(p * tw, -1)
    union = jnp.sum(p * p, -1) + jnp.sum(tw * tw, -1)
    dice = jnp.mean(1.0 - (2.0 * inter + _SMOOTH) / (union + _SMOOTH))
    # WeightedBCE([0.5, 0.5])
    xf, tf = x.reshape(-1), t.reshape(-1)
    bce_el = -(tf * jnp.maximum(jnp.log(xf), -100.0)
               + (1.0 - tf) * jnp.maximum(jnp.log(1.0 - xf), -100.0))
    pos = (tf > 0.5).astype(jnp.float32)
    neg = (tf < 0.5).astype(jnp.float32)
    bce = (_BCE_W[0] * jnp.sum(pos * bce_el) / (jnp.sum(pos) + _EPS)
           + _BCE_W[1] * jnp.sum(neg * bce_el) / (jnp.sum(neg) + _EPS))
    return dice_weight * dice + bce_weight * bce


if __name__ == "__main__":
    key = jax.random.PRNGKey(0)
    k1, k2, k3, k4 = jax.random.split(key, 4)

    # --- main case: binary masks, NCHW like the PyTorch module ----------------
    shape = (2, 4, 16, 16)
    inputs = jax.nn.sigmoid(jax.random.normal(k1, shape, dtype=jnp.float32))
    targets = (jax.random.uniform(k2, shape) > 0.5).astype(jnp.float32)

    loss_fn = jax.jit(functools.partial(weighted_dice_bce,
                                        dice_weight=1.0, bce_weight=1.0,
                                        binary_targets=True))
    loss = jax.block_until_ready(loss_fn(inputs, targets))
    ref = _reference(inputs, targets, 1.0, 1.0)
    assert jnp.allclose(loss, ref, rtol=1e-4, atol=1e-5), (loss, ref)

    # --- secondary case: soft targets + padding (exact general path) ----------
    shape2 = (2, 3, 10, 10)
    inputs2 = jax.nn.sigmoid(jax.random.normal(k3, shape2, dtype=jnp.float32))
    targets2 = jax.random.uniform(k4, shape2, dtype=jnp.float32)
    loss_fn2 = jax.jit(functools.partial(weighted_dice_bce,
                                         dice_weight=1.0, bce_weight=1.0,
                                         binary_targets=False))
    loss2 = jax.block_until_ready(loss_fn2(inputs2, targets2))
    ref2 = _reference(inputs2, targets2, 1.0, 1.0)
    assert jnp.allclose(loss2, ref2, rtol=1e-4, atol=1e-5), (loss2, ref2)

    print("KERNEL_OK")
</pallas_src>

<mosaic_0001>
module attributes {stable_mosaic.version = 11 : i64} {
  func.func @_partials_kernel(%arg0: i32, %arg1: i32, %arg2: memref<2x1x8x128xf32, #tpu.memory_space<vmem>>, %arg3: memref<2x1x8x128xf32, #tpu.memory_space<vmem>>, %arg4: memref<1x3x2x8x128xf32, #tpu.memory_space<vmem>>, %arg5: memref<1x2x8x128xf32, #tpu.memory_space<vmem>>, %arg6: memref<3x2x8x128xf32, #tpu.memory_space<vmem>>, %arg7: memref<2x8x128xf32, #tpu.memory_space<vmem>>) attributes {dimension_semantics = [#tpu.dimension_semantics<parallel>, #tpu.dimension_semantics<arbitrary>], iteration_bounds = array<i64: 1, 1>, scalar_prefetch = 0 : i64, scratch_operands = 2 : i64, tpu.core_type = #tpu.core_type<tc>, window_params = [{transform_indices = @transform_0, window_bounds = array<i64: 2, 1, 8, 128>}, {transform_indices = @transform_1, window_bounds = array<i64: 2, 1, 8, 128>}, {transform_indices = @transform_2, window_bounds = array<i64: 1, 3, 2, 8, 128>}, {transform_indices = @transform_3, window_bounds = array<i64: 1, 2, 8, 128>}]} {
    %c0_i32 = arith.constant 0 : i32
    %0 = arith.cmpi eq, %arg1, %c0_i32 : i32
    %1 = arith.extui %0 : i1 to i32
    %c0_i32_0 = arith.constant 0 : i32
    %2 = arith.cmpi ne, %1, %c0_i32_0 : i32
    scf.if %2 {
      %cst_49 = arith.constant 0.000000e+00 : f32
      %62 = vector.broadcast %cst_49 : f32 to vector<3x2x8x128xf32>
      %c0_50 = arith.constant 0 : index
      %c0_51 = arith.constant 0 : index
      %c0_52 = arith.constant 0 : index
      %c0_53 = arith.constant 0 : index
      %63 = vector.load %arg6[%c0_50, %c0_51, %c0_52, %c0_53] : memref<3x2x8x128xf32, #tpu.memory_space<vmem>>, vector<3x2x8x128xf32>
      tpu.vector_store %arg6[%c0_50, %c0_51, %c0_52, %c0_53], %62 {strides = array<i32>} : memref<3x2x8x128xf32, #tpu.memory_space<vmem>>, vector<3x2x8x128xf32>,
      %cst_54 = arith.constant 0.000000e+00 : f32
      %64 = vector.broadcast %cst_54 : f32 to vector<2x8x128xf32>
      %c0_55 = arith.constant 0 : index
      %c0_56 = arith.constant 0 : index
      %c0_57 = arith.constant 0 : index
      %65 = vector.load %arg7[%c0_55, %c0_56, %c0_57] : memref<2x8x128xf32, #tpu.memory_space<vmem>>, vector<2x8x128xf32>
      tpu.vector_store %arg7[%c0_55, %c0_56, %c0_57], %64 {strides = array<i32>} : memref<2x8x128xf32, #tpu.memory_space<vmem>>, vector<2x8x128xf32>,
    } else {
    }
    %cst = arith.constant 0.000000e+00 : f32
    %3 = vector.broadcast %cst : f32 to vector<2x8x128xf32>
    %cst_1 = arith.constant 0.000000e+00 : f32
    %4 = vector.broadcast %cst_1 : f32 to vector<8x128xf32>
    %c0_i32_2 = arith.constant 0 : i32
    %c0 = arith.constant 0 : index
    %5 = arith.index_cast %c0_i32_2 : i32 to index
    %c0_3 = arith.constant 0 : index
    %c0_4 = arith.constant 0 : index
    %6 = vector.load %arg2[%c0, %5, %c0_3, %c0_4] : memref<2x1x8x128xf32, #tpu.memory_space<vmem>>, vector<2x1x8x128xf32>
    %7 = vector.shape_cast %6 : vector<2x1x8x128xf32> to vector<2x8x128xf32>
    %c0_5 = arith.constant 0 : index
    %8 = arith.index_cast %c0_i32_2 : i32 to index
    %c0_6 = arith.constant 0 : index
    %c0_7 = arith.constant 0 : index
    %9 = vector.load %arg3[%c0_5, %8, %c0_6, %c0_7] : memref<2x1x8x128xf32, #tpu.memory_space<vmem>>, vector<2x1x8x128xf32>
    %10 = vector.shape_cast %9 : vector<2x1x8x128xf32> to vector<2x8x128xf32>
    %11 = arith.mulf %7, %10 : vector<2x8x128xf32>
    %12 = arith.addf %3, %11 : vector<2x8x128xf32>
    %13 = arith.mulf %7, %7 : vector<2x8x128xf32>
    %14 = arith.addf %3, %13 : vector<2x8x128xf32>
    %15 = arith.addf %3, %10 : vector<2x8x128xf32>
    %cst_8 = arith.constant 5.000000e-01 : f32
    %16 = vector.broadcast %cst_8 : f32 to vector<2x8x128xf32>
    %17 = arith.cmpf ogt, %10, %16 : vector<2x8x128xf32>
    %cst_9 = arith.constant 1.000000e+00 : f32
    %18 = vector.broadcast %cst_9 : f32 to vector<2x8x128xf32>
    %19 = arith.subf %18, %7 : vector<2x8x128xf32>
    %20 = arith.select %17, %7, %19 : vector<2x8x128xi1>, vector<2x8x128xf32>
    %21 = math.log %20 : vector<2x8x128xf32>
    %cst_10 = arith.constant -1.000000e+02 : f32
    %22 = vector.broadcast %cst_10 : f32 to vector<2x8x128xf32>
    %23 = arith.maximumf %21, %22 : vector<2x8x128xf32>
    %cst_11 = arith.constant dense<0.000000e+00> : vector<8x128xf32>
    %24 = vector.multi_reduction <add>, %23, %cst_11 [0] : vector<2x8x128xf32> to vector<8x128xf32>
    %25 = arith.addf %4, %24 : vector<8x128xf32>
    %26 = arith.mulf %10, %23 : vector<2x8x128xf32>
    %cst_12 = arith.constant dense<0.000000e+00> : vector<8x128xf32>
    %27 = vector.multi_reduction <add>, %26, %cst_12 [0] : vector<2x8x128xf32> to vector<8x128xf32>
    %28 = arith.addf %4, %27 : vector<8x128xf32>
    %c1_i32 = arith.constant 1 : i32
    %c0_13 = arith.constant 0 : index
    %c0_14 = arith.constant 0 : index
    %c0_15 = arith.constant 0 : index
    %c0_16 = arith.constant 0 : index
    %29 = vector.load %arg6[%c0_13, %c0_14, %c0_15, %c0_16] : memref<3x2x8x128xf32, #tpu.memory_space<vmem>>, vector<1x2x8x128xf32>
    %30 = vector.shape_cast %29 : vector<1x2x8x128xf32> to vector<2x8x128xf32>
    %31 = arith.addf %30, %12 : vector<2x8x128xf32>
    %c0_17 = arith.constant 0 : index
    %c0_18 = arith.constant 0 : index
    %c0_19 = arith.constant 0 : index
    %c0_20 = arith.constant 0 : index
    %32 = vector.load %arg6[%c0_17, %c0_18, %c0_19, %c0_20] : memref<3x2x8x128xf32, #tpu.memory_space<vmem>>, vector<1x2x8x128xf32>
    %33 = vector.shape_cast %32 : vector<1x2x8x128xf32> to vector<2x8x128xf32>
    %34 = vector.shape_cast %31 : vector<2x8x128xf32> to vector<1x2x8x128xf32>
    tpu.vector_store %arg6[%c0_17, %c0_18, %c0_19, %c0_20], %34 {strides = array<i32>} : memref<3x2x8x128xf32, #tpu.memory_space<vmem>>, vector<1x2x8x128xf32>,
    %c1 = arith.constant 1 : index
    %c0_21 = arith.constant 0 : index
    %c0_22 = arith.constant 0 : index
    %c0_23 = arith.constant 0 : index
    %35 = vector.load %arg6[%c1, %c0_21, %c0_22, %c0_23] : memref<3x2x8x128xf32, #tpu.memory_space<vmem>>, vector<1x2x8x128xf32>
    %36 = vector.shape_cast %35 : vector<1x2x8x128xf32> to vector<2x8x128xf32>
    %37 = arith.addf %36, %14 : vector<2x8x128xf32>
    %c1_24 = arith.constant 1 : index
    %c0_25 = arith.constant 0 : index
    %c0_26 = arith.constant 0 : index
    %c0_27 = arith.constant 0 : index
    %38 = vector.load %arg6[%c1_24, %c0_25, %c0_26, %c0_27] : memref<3x2x8x128xf32, #tpu.memory_space<vmem>>, vector<1x2x8x128xf32>
    %39 = vector.shape_cast %38 : vector<1x2x8x128xf32> to vector<2x8x128xf32>
    %40 = vector.shape_cast %37 : vector<2x8x128xf32> to vector<1x2x8x128xf32>
    tpu.vector_store %arg6[%c1_24, %c0_25, %c0_26, %c0_27], %40 {strides = array<i32>} : memref<3x2x8x128xf32, #tpu.memory_space<vmem>>, vector<1x2x8x128xf32>,
    %c2 = arith.constant 2 : index
    %c0_28 = arith.constant 0 : index
    %c0_29 = arith.constant 0 : index
    %c0_30 = arith.constant 0 : index
    %41 = vector.load %arg6[%c2, %c0_28, %c0_29, %c0_30] : memref<3x2x8x128xf32, #tpu.memory_space<vmem>>, vector<1x2x8x128xf32>
    %42 = vector.shape_cast %41 : vector<1x2x8x128xf32> to vector<2x8x128xf32>
    %43 = arith.addf %42, %15 : vector<2x8x128xf32>
    %c2_31 = arith.constant 2 : index
    %c0_32 = arith.constant 0 : index
    %c0_33 = arith.constant 0 : index
    %c0_34 = arith.constant 0 : index
    %44 = vector.load %arg6[%c2_31, %c0_32, %c0_33, %c0_34] : memref<3x2x8x128xf32, #tpu.memory_space<vmem>>, vector<1x2x8x128xf32>
    %45 = vector.shape_cast %44 : vector<1x2x8x128xf32> to vector<2x8x128xf32>
    %46 = vector.shape_cast %43 : vector<2x8x128xf32> to vector<1x2x8x128xf32>
    tpu.vector_store %arg6[%c2_31, %c0_32, %c0_33, %c0_34], %46 {strides = array<i32>} : memref<3x2x8x128xf32, #tpu.memory_space<vmem>>, vector<1x2x8x128xf32>,
    %c0_35 = arith.constant 0 : index
    %c0_36 = arith.constant 0 : index
    %c0_37 = arith.constant 0 : index
    %47 = vector.load %arg7[%c0_35, %c0_36, %c0_37] : memref<2x8x128xf32, #tpu.memory_space<vmem>>, vector<1x8x128xf32>
    %48 = vector.shape_cast %47 : vector<1x8x128xf32> to vector<8x128xf32>
    %49 = arith.addf %48, %25 : vector<8x128xf32>
    %c0_38 = arith.constant 0 : index
    %c0_39 = arith.constant 0 : index
    %c0_40 = arith.constant 0 : index
    %50 = vector.load %arg7[%c0_38, %c0_39, %c0_40] : memref<2x8x128xf32, #tpu.memory_space<vmem>>, vector<1x8x128xf32>
    %51 = vector.shape_cast %50 : vector<1x8x128xf32> to vector<8x128xf32>
    %52 = vector.shape_cast %49 : vector<8x128xf32> to vector<1x8x128xf32>
    tpu.vector_store %arg7[%c0_38, %c0_39, %c0_40], %52 {strides = array<i32>} : memref<2x8x128xf32, #tpu.memory_space<vmem>>, vector<1x8x128xf32>,
    %c1_41 = arith.constant 1 : index
    %c0_42 = arith.constant 0 : index
    %c0_43 = arith.constant 0 : index
    %53 = vector.load %arg7[%c1_41, %c0_42, %c0_43] : memref<2x8x128xf32, #tpu.memory_space<vmem>>, vector<1x8x128xf32>
    %54 = vector.shape_cast %53 : vector<1x8x128xf32> to vector<8x128xf32>
    %55 = arith.addf %54, %28 : vector<8x128xf32>
    %c1_44 = arith.constant 1 : index
    %c0_45 = arith.constant 0 : index
    %c0_46 = arith.constant 0 : index
    %56 = vector.load %arg7[%c1_44, %c0_45, %c0_46] : memref<2x8x128xf32, #tpu.memory_space<vmem>>, vector<1x8x128xf32>
    %57 = vector.shape_cast %56 : vector<1x8x128xf32> to vector<8x128xf32>
    %58 = vector.shape_cast %55 : vector<8x128xf32> to vector<1x8x128xf32>
    tpu.vector_store %arg7[%c1_44, %c0_45, %c0_46], %58 {strides = array<i32>} : memref<2x8x128xf32, #tpu.memory_space<vmem>>, vector<1x8x128xf32>,
    %c0_i32_47 = arith.constant 0 : i32
    %59 = arith.cmpi eq, %arg1, %c0_i32_47 : i32
    %60 = arith.extui %59 : i1 to i32
    %c0_i32_48 = arith.constant 0 : i32
    %61 = arith.cmpi ne, %60, %c0_i32_48 : i32
    scf.if %61 {
      %c0_49 = arith.constant 0 : index
      %c0_50 = arith.constant 0 : index
      %c0_51 = arith.constant 0 : index
      %c0_52 = arith.constant 0 : index
      %62 = vector.load %arg6[%c0_49, %c0_50, %c0_51, %c0_52] : memref<3x2x8x128xf32, #tpu.memory_space<vmem>>, vector<3x2x8x128xf32>
      %c0_53 = arith.constant 0 : index
      %c0_54 = arith.constant 0 : index
      %c0_55 = arith.constant 0 : index
      %c0_56 = arith.constant 0 : index
      %c0_57 = arith.constant 0 : index
      %63 = vector.load %arg4[%c0_53, %c0_54, %c0_55, %c0_56, %c0_57] : memref<1x3x2x8x128xf32, #tpu.memory_space<vmem>>, vector<1x3x2x8x128xf32>
      %64 = vector.shape_cast %63 : vector<1x3x2x8x128xf32> to vector<3x2x8x128xf32>
      %65 = vector.shape_cast %62 : vector<3x2x8x128xf32> to vector<1x3x2x8x128xf32>
      tpu.vector_store %arg4[%c0_53, %c0_54, %c0_55, %c0_56, %c0_57], %65 {strides = array<i32>} : memref<1x3x2x8x128xf32, #tpu.memory_space<vmem>>, vector<1x3x2x8x128xf32>,
      %c0_58 = arith.constant 0 : index
      %c0_59 = arith.constant 0 : index
      %c0_60 = arith.constant 0 : index
      %66 = vector.load %arg7[%c0_58, %c0_59, %c0_60] : memref<2x8x128xf32, #tpu.memory_space<vmem>>, vector<2x8x128xf32>
      %c0_61 = arith.constant 0 : index
      %c0_62 = arith.constant 0 : index
      %c0_63 = arith.constant 0 : index
      %c0_64 = arith.constant 0 : index
      %67 = vector.load %arg5[%c0_61, %c0_62, %c0_63, %c0_64] : memref<1x2x8x128xf32, #tpu.memory_space<vmem>>, vector<1x2x8x128xf32>
      %68 = vector.shape_cast %67 : vector<1x2x8x128xf32> to vector<2x8x128xf32>
      %69 = vector.shape_cast %66 : vector<2x8x128xf32> to vector<1x2x8x128xf32>
      tpu.vector_store %arg5[%c0_61, %c0_62, %c0_63, %c0_64], %69 {strides = array<i32>} : memref<1x2x8x128xf32, #tpu.memory_space<vmem>>, vector<1x2x8x128xf32>,
    } else {
    }
    return
  }
  func.func @transform_0(%arg0: i32, %arg1: i32) -> (i32, i32, i32, i32) {
    %c1_i32 = arith.constant 1 : i32
    %0 = arith.muli %arg0, %c1_i32 : i32
    %1 = arith.addi %0, %arg1 : i32
    %c0_i32 = arith.constant 0 : i32
    %c0_i32_0 = arith.constant 0 : i32
    %c0_i32_1 = arith.constant 0 : i32
    %c0_i32_2 = arith.constant 0 : i32
    return %c0_i32, %1, %c0_i32_0, %c0_i32_1 : i32, i32, i32, i32
  }
  func.func @transform_1(%arg0: i32, %arg1: i32) -> (i32, i32, i32, i32) {
    %c1_i32 = arith.constant 1 : i32
    %0 = arith.muli %arg0, %c1_i32 : i32
    %1 = arith.addi %0, %arg1 : i32
    %c0_i32 = arith.constant 0 : i32
    %c0_i32_0 = arith.constant 0 : i32
    %c0_i32_1 = arith.constant 0 : i32
    %c0_i32_2 = arith.constant 0 : i32
    return %c0_i32, %1, %c0_i32_0, %c0_i32_1 : i32, i32, i32, i32
  }
  func.func @transform_2(%arg0: i32, %arg1: i32) -> (i32, i32, i32, i32, i32) {
    %c0_i32 = arith.constant 0 : i32
    %c0_i32_0 = arith.constant 0 : i32
    %c0_i32_1 = arith.constant 0 : i32
    %c0_i32_2 = arith.constant 0 : i32
    %c0_i32_3 = arith.constant 0 : i32
    return %arg0, %c0_i32, %c0_i32_0, %c0_i32_1, %c0_i32_2 : i32, i32, i32, i32, i32
  }
  func.func @transform_3(%arg0: i32, %arg1: i32) -> (i32, i32, i32, i32) {
    %c0_i32 = arith.constant 0 : i32
    %c0_i32_0 = arith.constant 0 : i32
    %c0_i32_1 = arith.constant 0 : i32
    %c0_i32_2 = arith.constant 0 : i32
    return %arg0, %c0_i32, %c0_i32_0, %c0_i32_1 : i32, i32, i32, i32
  }
}

</mosaic_0001>

<bundles_post_ra>
// kernel: weighted_dice_bce.1
= control target key start
LH: loop header
LB: loop body
LE: loop exit
PB: predicated region body
PF: predicated region fallthrough
CT: control target
= control target key end

     0   :  { %s217_s0 = inlined_call_operand.vmem [shape: f32[2,1,8,128], index: 0, kind: input, shape index: {}]   ;;  %s218_s1 = inlined_call_operand.vmem [shape: f32[2,1,8,128], index: 1, kind: input, shape index: {}]   ;;  %s219_s2 = inlined_call_operand.vmem [shape: f32[1,3,2,8,128], index: 2, kind: output, shape index: {0}]   ;;  %s220_s3 = inlined_call_operand.vmem [shape: f32[1,2,8,128], index: 3, kind: output, shape index: {1}]  }
   0x1   :  { %v59_v0 = vld [vmem:[%s217_s0] sm:$0xff]  ;;  %v60_v2 = vld [vmem:[%s217_s0 + $0x8] sm:$0xff] }
   0x2   :  { %v61_v1 = vld [vmem:[%s218_s1] sm:$0xff]  ;;  %v75_v4 = vsub.f32 1.0, %v59_v0  ;;  %v62_v5 = vld [vmem:[%s218_s1 + $0x8] sm:$0xff]  ;;  %v76_v6 = vsub.f32 1.0, %v60_v2  ;;  %v67_v7 = vmul.f32 %v59_v0, %v59_v0  ;;  %v68_v9 = vmul.f32 %v60_v2, %v60_v2 }
   0x3   :  { %v63_v3 = vmul.f32 %v61_v1, %v59_v0  ;;  %131 = vst [vmem:[%s219_s2 + $0x20] sm:$0xff] %v61_v1  ;;  %v64_v8 = vmul.f32 %v62_v5, %v60_v2  ;;  %132 = vst [vmem:[%s219_s2 + $0x28] sm:$0xff] %v62_v5  ;;  %vm73_vm0 = vcmp.gt.f32.partialorder %v61_v1, 0.5  ;;  %vm74_vm1 = vcmp.gt.f32.partialorder %v62_v5, 0.5 }
   0x4   :  { %129 = vst [vmem:[%s219_s2 + $0x10] sm:$0xff] %v67_v7  ;;  %v77_v10 = vsel %vm73_vm0, %v59_v0, %v75_v4  ;;  %v78_v11 = vsel %vm74_vm1, %v60_v2, %v76_v6  ;;  %130 = vst [vmem:[%s219_s2 + $0x18] sm:$0xff] %v68_v9 }
   0x5   :  { %127 = vst [vmem:[%s219_s2] sm:$0xff] %v63_v3  ;;  %128 = vst [vmem:[%s219_s2 + $0x8] sm:$0xff] %v64_v8  ;;  %157 = vlog2.f32 %v77_v10 }
   0x6   :  { %159 = vlog2.f32 %v78_v11 }
   0xf   :  { %v158_v12 = vpop.eup %157 }
  0x10   :  { %v160_v13 = vpop.eup %159  ;;  %v80_v14 = vmul.f32 0.6931472, %v158_v12 }
  0x11   :  { %v82_v15 = vmul.f32 0.6931472, %v160_v13 }
  0x12   :  { %v83_v16 = vmax.f32 %v80_v14, -100.0 }
  0x13   :  { %v84_v17 = vmax.f32 %v82_v15, -100.0 }
  0x14   :  { %v87_v18 = vmul.f32 %v83_v16, %v61_v1 }
  0x15   :  { %v85_v19 = vadd.f32 %v84_v17, %v83_v16  ;;  %v88_v20 = vmul.f32 %v84_v17, %v62_v5 }
  0x17   :  { %135 = vst [vmem:[%s220_s3] sm:$0xff] %v85_v19  ;;  %v89_v21 = vadd.f32 %v88_v20, %v87_v18 }
  0x19   :  { %136 = vst [vmem:[%s220_s3 + $0x8] sm:$0xff] %v89_v21 }

</bundles_post_ra>
